<compile_context>
chip_gen: v7x
topology: tpu7x:2x2x1
jax: 0.10.0
libtpu: 0.0.40
codegen_flags: <defaults>
</compile_context>

<pallas_src>
import jax
import jax.numpy as jnp
from jax.experimental import pallas as pl
from jax.experimental.pallas import tpu as pltpu

NUM_PROMPTS = 4
EMBEDDING_SIZE = 768


def _round_up(x, m):
    return ((x + m - 1) // m) * m


def _embedding_kernel(ids_ref, table_ref, out_ref):
    # ids_ref:   (TN, 1) int32   (VMEM)
    # table_ref: (P,  E) float32 (VMEM, resident across grid steps)
    # out_ref:   (TN, E) float32 (VMEM)
    table = table_ref[...]                                      # (P, E)
    p_total = table_ref.shape[0]

    # Lane-broadcast the id column exactly once (single XLU pass), then every
    # compare/select below runs as full-width VPU work.
    ids_b = jnp.broadcast_to(ids_ref[...], out_ref.shape)       # (TN, E) int32

    # Start with row 0 broadcast across the tile, then select the other rows.
    out = jnp.broadcast_to(table[0:1, :], out_ref.shape)        # (TN, E)
    for p in range(1, p_total):
        out = jnp.where(ids_b == p, table[p:p + 1, :], out)     # VPU selects
    out_ref[...] = out.astype(out_ref.dtype)


def soft_prompt_embedding(input_ids, table, *, tile_n=512):
    """input_ids: (B, S) integer ids in [0, P); table: (P, E) -> (B, S, E)."""
    B, S = input_ids.shape
    P, E = table.shape
    N = B * S
    ids_col = input_ids.reshape(N, 1).astype(jnp.int32)

    # Tile size: multiple of 8 sublanes, capped at tile_n (~1.5 MiB f32 output
    # per step at E=768; double-buffered output + intermediates stay far below
    # the scoped-VMEM default on v5e/v6e/v7x).
    tn = min(tile_n, _round_up(N, 8))
    n_pad = _round_up(N, tn)
    if n_pad != N:
        ids_col = jnp.pad(ids_col, ((0, n_pad - N), (0, 0)))

    elem_bytes = jnp.dtype(table.dtype).itemsize
    cost = pl.CostEstimate(
        flops=2 * (P - 1) * n_pad * E,            # compare + select per row
        transcendentals=0,
        bytes_accessed=n_pad * 4 + P * E * elem_bytes + n_pad * E * elem_bytes,
    )

    out = pl.pallas_call(
        _embedding_kernel,
        out_shape=jax.ShapeDtypeStruct((n_pad, E), table.dtype),
        grid=(n_pad // tn,),
        in_specs=[
            pl.BlockSpec((tn, 1), lambda i: (i, 0)),   # ids tile
            pl.BlockSpec((P, E), lambda i: (0, 0)),    # table, resident
        ],
        out_specs=pl.BlockSpec((tn, E), lambda i: (i, 0)),
        compiler_params=pltpu.CompilerParams(
            dimension_semantics=("parallel",),
        ),
        cost_estimate=cost,
    )(ids_col, table)

    return out[:N].reshape(B, S, E)


if __name__ == "__main__":
    key = jax.random.PRNGKey(0)
    k_table, k_ids1, k_ids2 = jax.random.split(key, 3)

    # Deterministic parameter init: nn.Embedding default is N(0, 1).
    table = jax.random.normal(
        k_table, (NUM_PROMPTS, EMBEDDING_SIZE), dtype=jnp.float32
    )

    # Small example input: batch=2, seq=8 of prompt indices.
    B, S = 2, 8
    input_ids = jax.random.randint(
        k_ids1, (B, S), minval=0, maxval=NUM_PROMPTS, dtype=jnp.int32
    )
    out = soft_prompt_embedding(input_ids, table)
    out = jax.block_until_ready(out)
    ref = jnp.take(table, input_ids, axis=0)
    assert out.shape == (B, S, EMBEDDING_SIZE)
    assert jnp.allclose(out, ref, atol=1e-6), "mismatch vs reference gather"

    # Second check: exercises the grid (>1 step) and the tail-padding path.
    B2, S2 = 3, 700   # N = 2100 -> padded to 2560 with TN=512 (5 grid steps)
    input_ids2 = jax.random.randint(
        k_ids2, (B2, S2), minval=0, maxval=NUM_PROMPTS, dtype=jnp.int32
    )
    out2 = soft_prompt_embedding(input_ids2, table)
    out2 = jax.block_until_ready(out2)
    ref2 = jnp.take(table, input_ids2, axis=0)
    assert out2.shape == (B2, S2, EMBEDDING_SIZE)
    assert jnp.allclose(out2, ref2, atol=1e-6), "mismatch vs reference gather"

    print("KERNEL_OK")
</pallas_src>

<mosaic_0001>
module attributes {stable_mosaic.version = 11 : i64} {
  func.func @_embedding_kernel(%arg0: i32, %arg1: memref<16x1xi32, #tpu.memory_space<vmem>>, %arg2: memref<4x768xf32, #tpu.memory_space<vmem>>, %arg3: memref<16x768xf32, #tpu.memory_space<vmem>>) attributes {dimension_semantics = [#tpu.dimension_semantics<parallel>], iteration_bounds = array<i64: 1>, scalar_prefetch = 0 : i64, scratch_operands = 0 : i64, tpu.core_type = #tpu.core_type<tc>, window_params = [{transform_indices = @transform_0, window_bounds = array<i64: 16, 1>}, {pipeline_mode = #tpu.pipeline_mode<synchronous>, transform_indices = @transform_1, window_bounds = array<i64: 4, 768>}, {transform_indices = @transform_2, window_bounds = array<i64: 16, 768>}]} {
    %c0 = arith.constant 0 : index
    %c0_0 = arith.constant 0 : index
    %0 = vector.load %arg2[%c0, %c0_0] : memref<4x768xf32, #tpu.memory_space<vmem>>, vector<4x768xf32>
    %c0_1 = arith.constant 0 : index
    %c0_2 = arith.constant 0 : index
    %1 = vector.load %arg1[%c0_1, %c0_2] : memref<16x1xi32, #tpu.memory_space<vmem>>, vector<16x1xi32>
    %2 = vector.shape_cast %1 : vector<16x1xi32> to vector<16x1xi32>
    %3 = vector.broadcast %2 : vector<16x1xi32> to vector<16x768xi32>
    %4 = vector.extract_strided_slice %0 {offsets = [0, 0], sizes = [1, 768], strides = [1, 1]} : vector<4x768xf32> to vector<1x768xf32>
    %5 = vector.shape_cast %4 : vector<1x768xf32> to vector<1x768xf32>
    %6 = vector.broadcast %5 : vector<1x768xf32> to vector<16x768xf32>
    %c1_i32 = arith.constant 1 : i32
    %7 = vector.broadcast %c1_i32 : i32 to vector<16x768xi32>
    %8 = arith.cmpi eq, %3, %7 : vector<16x768xi32>
    %9 = vector.extract_strided_slice %0 {offsets = [1, 0], sizes = [1, 768], strides = [1, 1]} : vector<4x768xf32> to vector<1x768xf32>
    %10 = vector.shape_cast %9 : vector<1x768xf32> to vector<1x768xf32>
    %11 = vector.broadcast %10 : vector<1x768xf32> to vector<16x768xf32>
    %12 = arith.select %8, %11, %6 : vector<16x768xi1>, vector<16x768xf32>
    %c2_i32 = arith.constant 2 : i32
    %13 = vector.broadcast %c2_i32 : i32 to vector<16x768xi32>
    %14 = arith.cmpi eq, %3, %13 : vector<16x768xi32>
    %15 = vector.extract_strided_slice %0 {offsets = [2, 0], sizes = [1, 768], strides = [1, 1]} : vector<4x768xf32> to vector<1x768xf32>
    %16 = vector.shape_cast %15 : vector<1x768xf32> to vector<1x768xf32>
    %17 = vector.broadcast %16 : vector<1x768xf32> to vector<16x768xf32>
    %18 = arith.select %14, %17, %12 : vector<16x768xi1>, vector<16x768xf32>
    %c3_i32 = arith.constant 3 : i32
    %19 = vector.broadcast %c3_i32 : i32 to vector<16x768xi32>
    %20 = arith.cmpi eq, %3, %19 : vector<16x768xi32>
    %21 = vector.extract_strided_slice %0 {offsets = [3, 0], sizes = [1, 768], strides = [1, 1]} : vector<4x768xf32> to vector<1x768xf32>
    %22 = vector.shape_cast %21 : vector<1x768xf32> to vector<1x768xf32>
    %23 = vector.broadcast %22 : vector<1x768xf32> to vector<16x768xf32>
    %24 = arith.select %20, %23, %18 : vector<16x768xi1>, vector<16x768xf32>
    %c0_3 = arith.constant 0 : index
    %c0_4 = arith.constant 0 : index
    %25 = vector.load %arg3[%c0_3, %c0_4] : memref<16x768xf32, #tpu.memory_space<vmem>>, vector<16x768xf32>
    tpu.vector_store %arg3[%c0_3, %c0_4], %24 {strides = array<i32>} : memref<16x768xf32, #tpu.memory_space<vmem>>, vector<16x768xf32>,
    return
  }
  func.func @transform_0(%arg0: i32) -> (i32, i32) {
    %c0_i32 = arith.constant 0 : i32
    %c0_i32_0 = arith.constant 0 : i32
    return %arg0, %c0_i32 : i32, i32
  }
  func.func @transform_1(%arg0: i32) -> (i32, i32) {
    %c0_i32 = arith.constant 0 : i32
    %c0_i32_0 = arith.constant 0 : i32
    %c0_i32_1 = arith.constant 0 : i32
    return %c0_i32, %c0_i32_0 : i32, i32
  }
  func.func @transform_2(%arg0: i32) -> (i32, i32) {
    %c0_i32 = arith.constant 0 : i32
    %c0_i32_0 = arith.constant 0 : i32
    return %arg0, %c0_i32 : i32, i32
  }
}

</mosaic_0001>

<bundles_post_ra>
// kernel: tpu_custom_call.1
= control target key start
LH: loop header
LB: loop body
LE: loop exit
PB: predicated region body
PF: predicated region fallthrough
CT: control target
= control target key end

     0   :  { %7 = vsyncpa [#allocation3], 0  ;;  %s465_s0 = inlined_call_operand.vmem [shape: s32[16,1], index: 0, kind: input, shape index: {}]   ;;  %s466_s1 = inlined_call_operand.hbm [shape: f32[4,768], index: 1, kind: input, shape index: {}]   ;;  %s467_s2 = inlined_call_operand.hbm [shape: f32[16,768], index: 2, kind: output, shape index: {}]  }
   0x1   :  { %8 = vsyncpa [#allocation4], 0  ;;  %s379_s9 = smov [#allocation2]   ;;  %s331_s13 = scalar_lea.hbm %s466_s1, 384 }
   0x2   :  { %s17_s10 = sshll.u32 %s379_s9, 4  ;;  %p332_p0 = scmp.ne.s32.totalorder %s466_s1, %s331_s13  ;;  %s18_s10 = int_to_ptr.vmem [resolvable:$true] %s17_s10 }
   0x3   :  { %p335_p1 = scmp.lt.u32.totalorder %s331_s13, %s466_s1 }
   0x5   :  { %p337_p2 = pnand %p335_p1, %p332_p0 }
   0x7   :  { %340 = shalt.err (!%p337_p2)
}
   0x8   :  { %s341_s18 = scalar_lea.vmem %s18_s10, 384  ;;  %p346_p4 = scmp.lt.s32.totalorder %s18_s10, %s18_s10 }
   0x9   :  { %p342_p3 = scmp.ne.s32.totalorder %s18_s10, %s341_s18  ;;  %p347_p5 = scmp.lt.s32.totalorder %s341_s18, %s341_s18 }
   0xb   :  { %p348_p6 = por %p347_p5, %p346_p4 }
   0xd   :  { %p349_p7 = pnand %p348_p6, %p342_p3 }
   0xf   :  { %352 = shalt.err (!%p349_p7)
}
  0x10   :  { %20 = dma.hbm_to_vmem [thread:$0]  %s466_s1, 384, %s18_s10, [#allocation3]  }
  0x11   :  { %375 = dma.done.wait [#allocation3], 384  }
  0x12   :  { %376 = vsyncadd [#allocation3], 4294966912  ;;  %v380_v0 = vmov 0   ;;  %v27_v1 = vld [vmem:[%s465_s0] sm:$0xff]  ;;  %v28_v2 = vld [vmem:[%s465_s0 + $0x8] sm:$0xff]  ;;  %v38_v3 = vlaneseq  ;;  %s381_s0 = smov [#allocation5]  }
  0x13   :  { %330 = vset.pattern.permute.xlu0 %v380_v0  ;;  %v24_v7 = vld [vmem:[#allocation2] sm:$0xff]  ;;  %v25_v9 = vld [vmem:[#allocation2 + $0x8] sm:$0xff]  ;;  %v26_v10 = vld [vmem:[#allocation2 + $0x10] sm:$0xff]  ;;  %s313_s1 = sshll.u32 %s381_s0, 4  ;;  %s314_s1 = int_to_ptr.vmem [resolvable:$true] %s313_s1 }
  0x14   :  { %30 = vperm.xlu0 %330, %v27_v1   ;;  %v39_v4 = vshrl.u32 %v38_v3, 7  ;;  %s353_s25 = scalar_lea.vmem %s314_s1, 1536  ;;  %p358_p9 = scmp.lt.s32.totalorder %s314_s1, %s314_s1 }
  0x15   :  { %p354_p8 = scmp.ne.s32.totalorder %s314_s1, %s353_s25  ;;  %p359_p10 = scmp.lt.s32.totalorder %s353_s25, %s353_s25 }
  0x16   :  { %v40_v5 = vsub.s32 0, %v39_v4  ;;  %v44_v6 = vsub.s32 4, %v39_v4  ;;  %v96_v8 = vsub.s32 1, %v39_v4  ;;  %v100_v11 = vsub.s32 5, %v39_v4 }
  0x17   :  { %v164_v19 = vsub.s32 2, %v39_v4  ;;  %v168_v20 = vsub.s32 6, %v39_v4  ;;  %v232_v21 = vsub.s32 3, %v39_v4  ;;  %v236_v23 = vsub.s32 7, %v39_v4  ;;  %p360_p11 = por %p359_p10, %p358_p9 }
  0x18   :  { %33 = vperm.xlu0 %330, %v28_v2   ;;  %v41_v12 = vrot.slane %v24_v7, %v40_v5  ;;  %v45_v13 = vrot.slane %v24_v7, %v44_v6  ;;  %v49_v14 = vrot.slane %v25_v9, %v40_v5  ;;  %v53_v15 = vrot.slane %v25_v9, %v44_v6 }
  0x19   :  { %v57_v16 = vrot.slane %v26_v10, %v40_v5  ;;  %v61_v17 = vrot.slane %v26_v10, %v44_v6  ;;  %v97_v18 = vrot.slane %v24_v7, %v96_v8  ;;  %v101_v22 = vrot.slane %v24_v7, %v100_v11  ;;  %p361_p12 = pnand %p360_p11, %p354_p8 }
  0x1a   :  { %v417_v24 = vrot.slane %v41_v12, %v40_v5  ;;  %v419_v25 = vrot.slane %v45_v13, %v40_v5  ;;  %v105_v26 = vrot.slane %v25_v9, %v96_v8  ;;  %v421_v27 = vrot.slane %v49_v14, %v40_v5 }
  0x1b   :  { %v423_v28 = vrot.slane %v53_v15, %v40_v5  ;;  %v425_v29 = vrot.slane %v57_v16, %v40_v5  ;;  %v109_v30 = vrot.slane %v25_v9, %v100_v11  ;;  %v427_v31 = vrot.slane %v61_v17, %v40_v5 }
  0x1c   :  { %v113_v32 = vrot.slane %v26_v10, %v96_v8  ;;  %v117_v33 = vrot.slane %v26_v10, %v100_v11  ;;  %v127_v34 = vrot.slane %v97_v18, %v96_v8  ;;  %v131_v35 = vrot.slane %v101_v22, %v96_v8 }
  0x1d   :  { %v165_v36 = vrot.slane %v24_v7, %v164_v19  ;;  %v169_v37 = vrot.slane %v24_v7, %v168_v20  ;;  %v173_v38 = vrot.slane %v25_v9, %v164_v19  ;;  %v177_v39 = vrot.slane %v25_v9, %v168_v20 }
  0x1e   :  { %v181_v40 = vrot.slane %v26_v10, %v164_v19  ;;  %v185_v41 = vrot.slane %v26_v10, %v168_v20  ;;  %v233_v42 = vrot.slane %v24_v7, %v232_v21  ;;  %v237_v43 = vrot.slane %v24_v7, %v236_v23 }
  0x1f   :  { %v241_v44 = vrot.slane %v25_v9, %v232_v21  ;;  %v245_v45 = vrot.slane %v25_v9, %v236_v23  ;;  %v249_v46 = vrot.slane %v26_v10, %v232_v21  ;;  %v135_v47 = vrot.slane %v105_v26, %v96_v8 }
  0x20   :  { %v139_v48 = vrot.slane %v109_v30, %v96_v8  ;;  %v143_v49 = vrot.slane %v113_v32, %v96_v8  ;;  %v253_v50 = vrot.slane %v26_v10, %v236_v23  ;;  %v147_v51 = vrot.slane %v117_v33, %v96_v8 }
  0x21   :  { %v195_v52 = vrot.slane %v165_v36, %v164_v19  ;;  %v199_v53 = vrot.slane %v169_v37, %v164_v19  ;;  %v203_v54 = vrot.slane %v173_v38, %v164_v19  ;;  %v207_v55 = vrot.slane %v177_v39, %v164_v19 }
  0x22   :  { %v211_v56 = vrot.slane %v181_v40, %v164_v19  ;;  %v215_v57 = vrot.slane %v185_v41, %v164_v19  ;;  %v263_v58 = vrot.slane %v233_v42, %v232_v21  ;;  %v267_v60 = vrot.slane %v237_v43, %v232_v21 }
  0x23   :  { %v271_v61 = vrot.slane %v241_v44, %v232_v21  ;;  %v275_v62 = vrot.slane %v245_v45, %v232_v21  ;;  %v279_v63 = vrot.slane %v249_v46, %v232_v21  ;;  %v283_v0 = vrot.slane %v253_v50, %v232_v21 }
  0x93   :  { %v31_v59 = vpop.permute.xlu0 %30 }
  0x94   :  { %vm92_vm0 = vcmp.eq.s32.totalorder %v31_v59, 1  ;;  %vm160_vm1 = vcmp.eq.s32.totalorder %v31_v59, 2  ;;  %vm228_vm2 = vcmp.eq.s32.totalorder %v31_v59, 3 }
  0x95   :  { %v148_v1 = vsel %vm92_vm0, %v127_v34, %v417_v24  ;;  %v149_v2 = vsel %vm92_vm0, %v131_v35, %v419_v25  ;;  %v150_v3 = vsel %vm92_vm0, %v135_v47, %v421_v27  ;;  %v151_v4 = vsel %vm92_vm0, %v139_v48, %v423_v28 }
  0x96   :  { %v152_v5 = vsel %vm92_vm0, %v143_v49, %v425_v29  ;;  %v153_v6 = vsel %vm92_vm0, %v147_v51, %v427_v31  ;;  %v216_v7 = vsel %vm160_vm1, %v195_v52, %v148_v1  ;;  %v217_v8 = vsel %vm160_vm1, %v199_v53, %v149_v2 }
  0x97   :  { %v218_v9 = vsel %vm160_vm1, %v203_v54, %v150_v3  ;;  %v219_v10 = vsel %vm160_vm1, %v207_v55, %v151_v4  ;;  %v220_v11 = vsel %vm160_vm1, %v211_v56, %v152_v5  ;;  %v221_v12 = vsel %vm160_vm1, %v215_v57, %v153_v6  ;;  %v34_v13 = vpop.permute.xlu0 %33 }
  0x98   :  { %v284_v14 = vsel %vm228_vm2, %v263_v58, %v216_v7  ;;  %v285_v15 = vsel %vm228_vm2, %v267_v60, %v217_v8  ;;  %v286_v16 = vsel %vm228_vm2, %v271_v61, %v218_v9  ;;  %v287_v17 = vsel %vm228_vm2, %v275_v62, %v219_v10 }
  0x99   :  { %v288_v18 = vsel %vm228_vm2, %v279_v63, %v220_v11  ;;  %v289_v19 = vsel %vm228_vm2, %v283_v0, %v221_v12  ;;  %296 = vst [vmem:[#allocation5] sm:$0xff] %v284_v14  ;;  %297 = vst [vmem:[#allocation5 + $0x8] sm:$0xff] %v285_v15  ;;  %vm93_vm3 = vcmp.eq.s32.totalorder %v34_v13, 1  ;;  %vm161_vm4 = vcmp.eq.s32.totalorder %v34_v13, 2 }
  0x9a   :  { %298 = vst [vmem:[#allocation5 + $0x10] sm:$0xff] %v286_v16  ;;  %299 = vst [vmem:[#allocation5 + $0x18] sm:$0xff] %v287_v17  ;;  %v154_v20 = vsel %vm93_vm3, %v127_v34, %v417_v24  ;;  %v155_v21 = vsel %vm93_vm3, %v131_v35, %v419_v25  ;;  %v156_v22 = vsel %vm93_vm3, %v135_v47, %v421_v27  ;;  %vm229_vm5 = vcmp.eq.s32.totalorder %v34_v13, 3 }
  0x9b   :  { %300 = vst [vmem:[#allocation5 + $0x20] sm:$0xff] %v288_v18  ;;  %301 = vst [vmem:[#allocation5 + $0x28] sm:$0xff] %v289_v19  ;;  %v157_v23 = vsel %vm93_vm3, %v139_v48, %v423_v28  ;;  %v158_v26 = vsel %vm93_vm3, %v143_v49, %v425_v29  ;;  %v159_v30 = vsel %vm93_vm3, %v147_v51, %v427_v31 }
  0x9c   :  { %v222_v32 = vsel %vm161_vm4, %v195_v52, %v154_v20  ;;  %v223_v33 = vsel %vm161_vm4, %v199_v53, %v155_v21  ;;  %v224_v36 = vsel %vm161_vm4, %v203_v54, %v156_v22  ;;  %v225_v24 = vsel %vm161_vm4, %v207_v55, %v157_v23 }
  0x9d   :  { %v226_v25 = vsel %vm161_vm4, %v211_v56, %v158_v26  ;;  %v227_v27 = vsel %vm161_vm4, %v215_v57, %v159_v30  ;;  %v290_v28 = vsel %vm229_vm5, %v263_v58, %v222_v32  ;;  %v291_v34 = vsel %vm229_vm5, %v267_v60, %v223_v33 }
  0x9e   :  { %v292_v29 = vsel %vm229_vm5, %v271_v61, %v224_v36  ;;  %v293_v35 = vsel %vm229_vm5, %v275_v62, %v225_v24  ;;  %v294_v31 = vsel %vm229_vm5, %v279_v63, %v226_v25  ;;  %v295_v37 = vsel %vm229_vm5, %v283_v0, %v227_v27  ;;  %302 = vst [vmem:[#allocation5 + $0x30] sm:$0xff] %v290_v28 }
  0x9f   :  { %303 = vst [vmem:[#allocation5 + $0x38] sm:$0xff] %v291_v34  ;;  %304 = vst [vmem:[#allocation5 + $0x40] sm:$0xff] %v292_v29 }
  0xa0   :  { %305 = vst [vmem:[#allocation5 + $0x48] sm:$0xff] %v293_v35  ;;  %306 = vst [vmem:[#allocation5 + $0x50] sm:$0xff] %v294_v31 }
  0xa1   :  { %307 = vst [vmem:[#allocation5 + $0x58] sm:$0xff] %v295_v37 }
  0xa2   :  { %364 = shalt.err (!%p361_p12)
}
  0xa3   :  { %s365_s28 = scalar_lea.hbm %s467_s2, 1536 }
  0xa4   :  { %p366_p13 = scmp.ne.s32.totalorder %s467_s2, %s365_s28  ;;  %p369_p0 = scmp.lt.u32.totalorder %s365_s28, %s467_s2 }
  0xa6   :  { %p371_p1 = pnand %p369_p0, %p366_p13 }
  0xa8   :  { %374 = shalt.err (!%p371_p1)
}
  0xa9   :  { %s382_s5 = smov 768   ;;  %s383_s6 = smov 48  }
  0xaa   :  { %319 = dma.vmem_to_hbm [thread:$0]  %s314_s1, 1536, %s467_s2, [#allocation4], %s382_s5, %s382_s5, %s383_s6  }
  0xab   :  { %377 = dma.done.wait [#allocation4], 1536  }
  0xac   :  { %378 = vsyncadd [#allocation4], 4294965760 }
  0xad   :  { %323 = vsyncpa [#allocation3], 1 }
  0xae   :  { %324 = vsyncpa [#allocation4], 1 }

</bundles_post_ra>
